<compile_context>
chip_gen: v7x
topology: tpu7x:2x2x1
jax: 0.10.0
libtpu: 0.0.40
codegen_flags: <defaults>
</compile_context>

<pallas_src>
import math

import jax
import jax.numpy as jnp
from jax.experimental import pallas as pl
from jax.experimental.pallas import tpu as pltpu


# ------------------------- primary: zero-copy identity ----------------------
def _idle_noop_kernel(x_ref, o_ref):
    # Output buffer is aliased to the input buffer; identity needs no work.
    del x_ref, o_ref


def idle_layer(x):
    """IdleLayer.forward(input) -> input.  Aliased, no DMA, no-op body."""
    if x.size == 0:
        return x
    return pl.pallas_call(
        _idle_noop_kernel,
        out_shape=jax.ShapeDtypeStruct(x.shape, x.dtype),
        in_specs=[pl.BlockSpec(memory_space=pl.ANY)],   # raw HBM ref, no auto-DMA
        out_specs=pl.BlockSpec(memory_space=pl.ANY),    # raw HBM ref, no auto-DMA
        input_output_aliases={0: 0},                    # output IS the input buffer
        compiler_params=pltpu.CompilerParams(has_side_effects=True),
    )(x)


# --------------------- fallback: explicit pipelined HBM copy ----------------
def _copy_kernel(x_ref, o_ref):
    o_ref[...] = x_ref[...]


def _vmem_budget_bytes():
    """Generation-aware scoped-VMEM budget with a safe default."""
    cap = 128 << 20
    try:
        info_cap = pltpu.get_tpu_info().vmem_capacity_bytes
        if isinstance(info_cap, int) and info_cap > 0:
            cap = info_cap
    except Exception:
        pass  # query unavailable -> assume the conservative default above
    # Never ask for more than half of physical VMEM (v7x has only 64 MiB/TC).
    return min(64 << 20, cap // 2)


def idle_layer_copy(x):
    """Identity as an explicit tiled copy (only if aliasing is disallowed)."""
    if x.size == 0 or x.ndim == 0:
        return idle_layer(x)

    shape = x.shape
    if x.ndim == 1:  # promote to a lane-dense 2-D view (full-extent last dim)
        return idle_layer_copy(x.reshape(1, shape[0])).reshape(shape)

    itemsize = jnp.dtype(x.dtype).itemsize
    sub_mult = 8 * max(1, 4 // itemsize)            # 8 f32 / 16 bf16 / 32 int8
    vmem_limit = _vmem_budget_bytes()               # 64 MiB v5e/v6e, 32 MiB v7x
    # ~8 MiB/buffer on v5e/v6e, ~4 MiB on v7x: in+out double-buffering stays
    # well under the scoped VMEM limit on every generation.
    target_block_bytes = max(2 << 20, min(8 << 20, vmem_limit // 8))

    total_bytes = x.size * itemsize
    row_bytes = math.prod(shape[1:]) * itemsize     # bytes per index of axis 0
    block0 = max(1, min(shape[0], target_block_bytes // max(1, row_bytes)))
    # Give both v7x TensorCores work when the input spans >= 2 blocks.
    if total_bytes >= (2 << 20) and shape[0] >= 2:
        block0 = min(block0, pl.cdiv(shape[0], 2))
    if x.ndim == 2 and block0 != shape[0]:
        # 2-D: the tiled axis is the sublane axis -> keep it (8*pack)-aligned.
        block0 = min(shape[0], max(sub_mult, (block0 // sub_mult) * sub_mult))

    block_shape = (block0,) + shape[1:]             # trailing dims full-extent
    grid = (pl.cdiv(shape[0], block0),)
    nd = x.ndim
    index_map = lambda i: (i,) + (0,) * (nd - 1)

    return pl.pallas_call(
        _copy_kernel,
        out_shape=jax.ShapeDtypeStruct(shape, x.dtype),
        grid=grid,
        in_specs=[pl.BlockSpec(block_shape, index_map)],
        out_specs=pl.BlockSpec(block_shape, index_map),
        compiler_params=pltpu.CompilerParams(
            dimension_semantics=("parallel",),
            vmem_limit_bytes=vmem_limit,
        ),
        cost_estimate=pl.CostEstimate(
            flops=0, transcendentals=0, bytes_accessed=2 * total_bytes),
    )(x)


if __name__ == "__main__":
    key = jax.random.PRNGKey(0)
    x = jax.random.normal(key, (2, 4, 16, 16), dtype=jnp.float32)

    # Primary: aliased, zero-DMA identity.  (Defensive fallback: if this
    # jax/libtpu build rejects the alias+no-op pattern, validate via the
    # explicit copy kernel instead so the script still runs clean.)
    try:
        y = idle_layer(x)
        jax.block_until_ready(y)
    except Exception:
        y = idle_layer_copy(x)
        jax.block_until_ready(y)
    assert y.shape == x.shape and y.dtype == x.dtype
    assert bool(jnp.all(y == x))

    # Fallback path is also exercised so both kernels are verified on TPU.
    y2 = idle_layer_copy(x)
    jax.block_until_ready(y2)
    assert y2.shape == x.shape and y2.dtype == x.dtype
    assert bool(jnp.all(y2 == x))

    print("KERNEL_OK")
</pallas_src>

<mosaic_0001>
module attributes {stable_mosaic.version = 11 : i64} {
  func.func @_idle_noop_kernel(%arg0: memref<2x4x16x16xf32, #tpu.memory_space<any>>, %arg1: memref<2x4x16x16xf32, #tpu.memory_space<any>>) attributes {dimension_semantics = [], scalar_prefetch = 0 : i64, scratch_operands = 0 : i64, tpu.core_type = #tpu.core_type<tc>} {
    return
  }
}

module attributes {stable_mosaic.version = 11 : i64} {
  func.func @_copy_kernel(%arg0: i32, %arg1: memref<2x4x16x16xf32, #tpu.memory_space<vmem>>, %arg2: memref<2x4x16x16xf32, #tpu.memory_space<vmem>>) attributes {dimension_semantics = [#tpu.dimension_semantics<parallel>], iteration_bounds = array<i64: 1>, scalar_prefetch = 0 : i64, scratch_operands = 0 : i64, tpu.core_type = #tpu.core_type<tc>, window_params = [{transform_indices = @transform_0, window_bounds = array<i64: 2, 4, 16, 16>}, {transform_indices = @transform_1, window_bounds = array<i64: 2, 4, 16, 16>}]} {
    %c0 = arith.constant 0 : index
    %c0_0 = arith.constant 0 : index
    %c0_1 = arith.constant 0 : index
    %c0_2 = arith.constant 0 : index
    %0 = vector.load %arg1[%c0, %c0_0, %c0_1, %c0_2] : memref<2x4x16x16xf32, #tpu.memory_space<vmem>>, vector<2x4x16x16xf32>
    %c0_3 = arith.constant 0 : index
    %c0_4 = arith.constant 0 : index
    %c0_5 = arith.constant 0 : index
    %c0_6 = arith.constant 0 : index
    %1 = vector.load %arg2[%c0_3, %c0_4, %c0_5, %c0_6] : memref<2x4x16x16xf32, #tpu.memory_space<vmem>>, vector<2x4x16x16xf32>
    tpu.vector_store %arg2[%c0_3, %c0_4, %c0_5, %c0_6], %0 {strides = array<i32>} : memref<2x4x16x16xf32, #tpu.memory_space<vmem>>, vector<2x4x16x16xf32>,
    return
  }
  func.func @transform_0(%arg0: i32) -> (i32, i32, i32, i32) {
    %c0_i32 = arith.constant 0 : i32
    %c0_i32_0 = arith.constant 0 : i32
    %c0_i32_1 = arith.constant 0 : i32
    %c0_i32_2 = arith.constant 0 : i32
    return %arg0, %c0_i32, %c0_i32_0, %c0_i32_1 : i32, i32, i32, i32
  }
  func.func @transform_1(%arg0: i32) -> (i32, i32, i32, i32) {
    %c0_i32 = arith.constant 0 : i32
    %c0_i32_0 = arith.constant 0 : i32
    %c0_i32_1 = arith.constant 0 : i32
    %c0_i32_2 = arith.constant 0 : i32
    return %arg0, %c0_i32, %c0_i32_0, %c0_i32_1 : i32, i32, i32, i32
  }
}

</mosaic_0001>

<bundles_post_ra>
// kernel: tpu_custom_call.1
= control target key start
LH: loop header
LB: loop body
LE: loop exit
PB: predicated region body
PF: predicated region fallthrough
CT: control target
= control target key end

     0   :  { %s16_s0 = inlined_call_operand.hbm [shape: f32[2,4,16,16], index: 0, kind: input, shape index: {}, may-alias: {0,1}]   ;;  %s17_s1 = inlined_call_operand.hbm [shape: f32[2,4,16,16], index: 1, kind: output, shape index: {}, may-alias: {0,1}]  }

// kernel: tpu_custom_call.1
= control target key start
LH: loop header
LB: loop body
LE: loop exit
PB: predicated region body
PF: predicated region fallthrough
CT: control target
= control target key end

     0   :  { %6 = vsyncpa [#allocation3], 0  ;;  %s185_s0 = inlined_call_operand.hbm [shape: f32[2,4,16,16], index: 0, kind: input, shape index: {}]   ;;  %s186_s1 = inlined_call_operand.hbm [shape: f32[2,4,16,16], index: 1, kind: output, shape index: {}]  }
   0x1   :  { %7 = vsyncpa [#allocation4], 0  ;;  %s125_s6 = smov [#allocation2]   ;;  %s77_s10 = scalar_lea.hbm %s185_s0, 2048 }
   0x2   :  { %s13_s7 = sshll.u32 %s125_s6, 4  ;;  %p78_p0 = scmp.ne.s32.totalorder %s185_s0, %s77_s10  ;;  %s14_s7 = int_to_ptr.vmem [resolvable:$true] %s13_s7 }
   0x3   :  { %p81_p1 = scmp.lt.u32.totalorder %s77_s10, %s185_s0 }
   0x5   :  { %p83_p2 = pnand %p81_p1, %p78_p0 }
   0x7   :  { %86 = shalt.err (!%p83_p2)
}
   0x8   :  { %s87_s15 = scalar_lea.vmem %s14_s7, 2048  ;;  %p92_p4 = scmp.lt.s32.totalorder %s14_s7, %s14_s7 }
   0x9   :  { %p88_p3 = scmp.ne.s32.totalorder %s14_s7, %s87_s15  ;;  %p93_p5 = scmp.lt.s32.totalorder %s87_s15, %s87_s15 }
   0xb   :  { %p94_p6 = por %p93_p5, %p92_p4 }
   0xd   :  { %p95_p7 = pnand %p94_p6, %p88_p3 }
   0xf   :  { %98 = shalt.err (!%p95_p7)
}
  0x10   :  { %s126_s16 = smov 128   ;;  %s127_s17 = smov 8  }
  0x11   :  { %19 = dma.hbm_to_vmem [thread:$0]  %s185_s0, 2048, %s14_s7, [#allocation3], %s126_s16, %s126_s16, %s127_s17  }
  0x12   :  { %121 = dma.done.wait [#allocation3], 2048  }
  0x13   :  { %122 = vsyncadd [#allocation3], 4294965248  ;;  %vm39_vm0 = vcmask 130048   ;;  %v23_v0 = vld [vmem:[#allocation2] sm:$0xff]  ;;  %v24_v1 = vld [vmem:[#allocation2 + $0x8] sm:$0xff]  ;;  %s128_s20 = smov [#allocation5]  }
  0x14   :  { %v25_v2 = vld [vmem:[#allocation2 + $0x10] sm:$0xff]  ;;  %40 = vst.msk [vmem:[#allocation5] sm:$0xff] %vm39_vm0, %v23_v0  ;;  %41 = vst.msk [vmem:[#allocation5 + $0x8] sm:$0xff] %vm39_vm0, %v24_v1  ;;  %v26_v3 = vld [vmem:[#allocation2 + $0x18] sm:$0xff]  ;;  %s61_s21 = sshll.u32 %s128_s20, 4  ;;  %s62_s21 = int_to_ptr.vmem [resolvable:$true] %s61_s21 }
  0x15   :  { %42 = vst.msk [vmem:[#allocation5 + $0x10] sm:$0xff] %vm39_vm0, %v25_v2  ;;  %v27_v4 = vld [vmem:[#allocation2 + $0x20] sm:$0xff]  ;;  %v28_v5 = vld [vmem:[#allocation2 + $0x28] sm:$0xff]  ;;  %43 = vst.msk [vmem:[#allocation5 + $0x18] sm:$0xff] %vm39_vm0, %v26_v3  ;;  %s99_s0 = scalar_lea.vmem %s62_s21, 2048  ;;  %p104_p9 = scmp.lt.s32.totalorder %s62_s21, %s62_s21 }
  0x16   :  { %44 = vst.msk [vmem:[#allocation5 + $0x20] sm:$0xff] %vm39_vm0, %v27_v4  ;;  %45 = vst.msk [vmem:[#allocation5 + $0x28] sm:$0xff] %vm39_vm0, %v28_v5  ;;  %v29_v6 = vld [vmem:[#allocation2 + $0x30] sm:$0xff]  ;;  %v30_v7 = vld [vmem:[#allocation2 + $0x38] sm:$0xff]  ;;  %p100_p8 = scmp.ne.s32.totalorder %s62_s21, %s99_s0  ;;  %p105_p10 = scmp.lt.s32.totalorder %s99_s0, %s99_s0 }
  0x17   :  { %v31_v8 = vld [vmem:[#allocation2 + $0x40] sm:$0xff]  ;;  %46 = vst.msk [vmem:[#allocation5 + $0x30] sm:$0xff] %vm39_vm0, %v29_v6  ;;  %47 = vst.msk [vmem:[#allocation5 + $0x38] sm:$0xff] %vm39_vm0, %v30_v7  ;;  %v32_v9 = vld [vmem:[#allocation2 + $0x48] sm:$0xff] }
  0x18   :  { %48 = vst.msk [vmem:[#allocation5 + $0x40] sm:$0xff] %vm39_vm0, %v31_v8  ;;  %v33_v10 = vld [vmem:[#allocation2 + $0x50] sm:$0xff]  ;;  %v34_v11 = vld [vmem:[#allocation2 + $0x58] sm:$0xff]  ;;  %49 = vst.msk [vmem:[#allocation5 + $0x48] sm:$0xff] %vm39_vm0, %v32_v9  ;;  %p106_p11 = por %p105_p10, %p104_p9 }
  0x19   :  { %50 = vst.msk [vmem:[#allocation5 + $0x50] sm:$0xff] %vm39_vm0, %v33_v10  ;;  %51 = vst.msk [vmem:[#allocation5 + $0x58] sm:$0xff] %vm39_vm0, %v34_v11  ;;  %v35_v12 = vld [vmem:[#allocation2 + $0x60] sm:$0xff]  ;;  %v36_v13 = vld [vmem:[#allocation2 + $0x68] sm:$0xff] }
  0x1a   :  { %v37_v14 = vld [vmem:[#allocation2 + $0x70] sm:$0xff]  ;;  %52 = vst.msk [vmem:[#allocation5 + $0x60] sm:$0xff] %vm39_vm0, %v35_v12  ;;  %53 = vst.msk [vmem:[#allocation5 + $0x68] sm:$0xff] %vm39_vm0, %v36_v13  ;;  %v38_v15 = vld [vmem:[#allocation2 + $0x78] sm:$0xff]  ;;  %p107_p12 = pnand %p106_p11, %p100_p8 }
  0x1b   :  { %54 = vst.msk [vmem:[#allocation5 + $0x70] sm:$0xff] %vm39_vm0, %v37_v14  ;;  %55 = vst.msk [vmem:[#allocation5 + $0x78] sm:$0xff] %vm39_vm0, %v38_v15 }
  0x1c   :  { %110 = shalt.err (!%p107_p12)
}
  0x1d   :  { %s111_s24 = scalar_lea.hbm %s186_s1, 2048 }
  0x1e   :  { %p112_p13 = scmp.ne.s32.totalorder %s186_s1, %s111_s24  ;;  %p115_p0 = scmp.lt.u32.totalorder %s111_s24, %s186_s1 }
  0x20   :  { %p117_p1 = pnand %p115_p0, %p112_p13 }
  0x22   :  { %120 = shalt.err (!%p117_p1)
}
  0x23   :  { %67 = dma.vmem_to_hbm [thread:$0]  %s62_s21, 2048, %s186_s1, [#allocation4], %s126_s16, %s126_s16, %s127_s17  }
  0x24   :  { %123 = dma.done.wait [#allocation4], 2048  }
  0x25   :  { %124 = vsyncadd [#allocation4], 4294965248 }
  0x26   :  { %71 = vsyncpa [#allocation3], 1 }
  0x27   :  { %72 = vsyncpa [#allocation4], 1 }

</bundles_post_ra>
